<compile_context>
chip_gen: v6e
topology: v6e:2x2x1
jax: 0.10.0
libtpu: 0.0.40
codegen_flags: <defaults>
</compile_context>

<pallas_src>
import jax
import jax.numpy as jnp
from jax.experimental import pallas as pl
from jax.experimental.pallas import tpu as pltpu

HIDDEN = 128
LANE = 128  # TPU lane width; output columns are padded to a multiple of this.


def _round_up(n: int, m: int) -> int:
    return ((n + m - 1) // m) * m


# ---------------------------------------------------------------------------
# Kernel
# ---------------------------------------------------------------------------
def mlp_kernel(x_ref, w1_ref, b1_ref, w2_ref, b2_ref, w3_ref, b3_ref, o_ref):
    # Layer 1: Linear + ReLU. bf16 MXU matmul, f32 accumulate; bias+ReLU in f32 (VPU).
    h1 = jnp.dot(x_ref[...], w1_ref[...], preferred_element_type=jnp.float32)
    h1 = jnp.maximum(h1 + b1_ref[...], 0.0)
    # Layer 2: Linear + ReLU.
    h2 = jnp.dot(h1.astype(w2_ref.dtype), w2_ref[...],
                 preferred_element_type=jnp.float32)
    h2 = jnp.maximum(h2 + b2_ref[...], 0.0)
    # Layer 3: Linear (no activation), lane-dense (TB, 128) output slab.
    out = jnp.dot(h2.astype(w3_ref.dtype), w3_ref[...],
                  preferred_element_type=jnp.float32)
    o_ref[...] = (out + b3_ref[...]).astype(o_ref.dtype)


# ---------------------------------------------------------------------------
# Parameter preparation (done ONCE, not per forward call)
# ---------------------------------------------------------------------------
def prepare_params(params, compute_dtype=jnp.bfloat16):
    """Convert torch-convention params (W: (out, in), b: (out,)) into kernel-ready
    form: pre-transposed (in, out) bf16 weights, (1, out) f32 biases, and a
    zero-padded lane-dense final layer (128 output columns)."""
    out_dim = params["w3"].shape[0]
    out_pad = _round_up(max(out_dim, 1), LANE)

    w3t = jnp.zeros((HIDDEN, out_pad), jnp.float32).at[:, :out_dim].set(params["w3"].T)
    b3 = jnp.zeros((1, out_pad), jnp.float32).at[:, :out_dim].set(params["b3"])

    return {
        "w1": params["w1"].T.astype(compute_dtype),            # (in_dim, 128)
        "b1": params["b1"].reshape(1, -1).astype(jnp.float32),  # (1, 128)
        "w2": params["w2"].T.astype(compute_dtype),             # (128, 128)
        "b2": params["b2"].reshape(1, -1).astype(jnp.float32),  # (1, 128)
        "w3": w3t.astype(compute_dtype),                        # (128, out_pad)
        "b3": b3,                                               # (1, out_pad)
        "out_dim": out_dim,
    }


# ---------------------------------------------------------------------------
# Forward wrapper
# ---------------------------------------------------------------------------
def network_forward(x, kp, *, tb=512):
    """x: (B, in_dim) float32. kp: output of prepare_params. Returns (B, out_dim) f32."""
    B, in_dim = x.shape
    out_pad = kp["w3"].shape[1]
    out_dim = kp["out_dim"]

    # Batch tile: multiple of 8 sublanes, capped at `tb` (512 default per tile sweep).
    TB = min(tb, _round_up(B, 8))
    B_pad = _round_up(B, TB)

    # Cast x once (halves HBM traffic of the only B-scaling operand) and pad batch.
    xb = x.astype(kp["w1"].dtype)
    if B_pad != B:
        xb = jnp.pad(xb, ((0, B_pad - B), (0, 0)))

    grid = (B_pad // TB,)

    resident = lambda a: pl.BlockSpec(a.shape, lambda i: (0,) * a.ndim)

    out = pl.pallas_call(
        mlp_kernel,
        out_shape=jax.ShapeDtypeStruct((B_pad, out_pad), jnp.float32),
        grid=grid,
        in_specs=[
            pl.BlockSpec((TB, in_dim), lambda i: (i, 0)),   # x: streamed per tile
            resident(kp["w1"]), resident(kp["b1"]),          # weights/biases: resident
            resident(kp["w2"]), resident(kp["b2"]),
            resident(kp["w3"]), resident(kp["b3"]),
        ],
        out_specs=pl.BlockSpec((TB, out_pad), lambda i: (i, 0)),
        compiler_params=pltpu.CompilerParams(
            dimension_semantics=("parallel",)),
    )(xb, kp["w1"], kp["b1"], kp["w2"], kp["b2"], kp["w3"], kp["b3"])

    return out[:B, :out_dim]


# ---------------------------------------------------------------------------
# Init + references
# ---------------------------------------------------------------------------
def init_params(key, in_dim, out_dim, hidden=HIDDEN):
    """Deterministic init mirroring nn.Linear shapes (W: (out, in), b: (out,))."""
    ks = jax.random.split(key, 6)

    def linear_init(kw, kb, fan_in, fan_out):
        bound = 1.0 / jnp.sqrt(fan_in)
        w = jax.random.uniform(kw, (fan_out, fan_in), jnp.float32, -bound, bound)
        b = jax.random.uniform(kb, (fan_out,), jnp.float32, -bound, bound)
        return w, b

    w1, b1 = linear_init(ks[0], ks[1], in_dim, hidden)
    w2, b2 = linear_init(ks[2], ks[3], hidden, hidden)
    w3, b3 = linear_init(ks[4], ks[5], hidden, out_dim)
    return {"w1": w1, "b1": b1, "w2": w2, "b2": b2, "w3": w3, "b3": b3}


def reference_forward_f32(x, p):
    h1 = jnp.maximum(x @ p["w1"].T + p["b1"], 0.0)
    h2 = jnp.maximum(h1 @ p["w2"].T + p["b2"], 0.0)
    return h2 @ p["w3"].T + p["b3"]


def reference_forward_bf16(x, p):
    """Mirrors the kernel's compute dtypes (bf16 matmul inputs, f32 accumulation)."""
    c = jnp.bfloat16
    h1 = jnp.dot(x.astype(c), p["w1"].T.astype(c), preferred_element_type=jnp.float32)
    h1 = jnp.maximum(h1 + p["b1"], 0.0)
    h2 = jnp.dot(h1.astype(c), p["w2"].T.astype(c), preferred_element_type=jnp.float32)
    h2 = jnp.maximum(h2 + p["b2"], 0.0)
    return jnp.dot(h2.astype(c), p["w3"].T.astype(c),
                   preferred_element_type=jnp.float32) + p["b3"]


# ---------------------------------------------------------------------------
# Self-test
# ---------------------------------------------------------------------------
if __name__ == "__main__":
    key = jax.random.PRNGKey(0)
    k_x1, k_x2, k_p = jax.random.split(key, 3)

    in_dim, out_dim = 4, 2            # CartPole-like DQN: state dim 4, 2 actions
    params = init_params(k_p, in_dim, out_dim)
    kparams = prepare_params(params)  # one-time: transpose / reshape / cast / pad

    # Case 1: tiny DQN batch (single grid step).
    x_small = jax.random.normal(k_x1, (8, in_dim), jnp.float32)
    out_small = jax.block_until_ready(network_forward(x_small, kparams))

    # Case 2: larger batch with a non-divisible size -> exercises batch padding and
    # a multi-step "parallel" grid with resident weights (tb shrunk to keep it small).
    x_large = jax.random.normal(k_x2, (300, in_dim), jnp.float32)
    out_large = jax.block_until_ready(network_forward(x_large, kparams, tb=128))

    for x, out in ((x_small, out_small), (x_large, out_large)):
        assert out.shape == (x.shape[0], out_dim)
        ref_bf16 = reference_forward_bf16(x, params)[:, :out_dim]
        ref_f32 = reference_forward_f32(x, params)
        # Tight check vs. a reference using identical compute dtypes.
        assert jnp.allclose(out, ref_bf16, atol=1e-4, rtol=1e-4), "mismatch vs bf16 reference"
        # Loose sanity check vs. the pure-f32 reference (bf16 rounding tolerance).
        assert jnp.allclose(out, ref_f32, atol=5e-2, rtol=5e-2), "mismatch vs f32 reference"

    print("KERNEL_OK")
</pallas_src>

<mosaic_0001>
module attributes {stable_mosaic.version = 11 : i64} {
  func.func @mlp_kernel(%arg0: i32, %arg1: memref<8x4xbf16, #tpu.memory_space<vmem>>, %arg2: memref<4x128xbf16, #tpu.memory_space<vmem>>, %arg3: memref<1x128xf32, #tpu.memory_space<vmem>>, %arg4: memref<128x128xbf16, #tpu.memory_space<vmem>>, %arg5: memref<1x128xf32, #tpu.memory_space<vmem>>, %arg6: memref<128x128xbf16, #tpu.memory_space<vmem>>, %arg7: memref<1x128xf32, #tpu.memory_space<vmem>>, %arg8: memref<8x128xf32, #tpu.memory_space<vmem>>) attributes {dimension_semantics = [#tpu.dimension_semantics<parallel>], iteration_bounds = array<i64: 1>, scalar_prefetch = 0 : i64, scratch_operands = 0 : i64, tpu.core_type = #tpu.core_type<tc>, window_params = [{transform_indices = @transform_0, window_bounds = array<i64: 8, 4>}, {pipeline_mode = #tpu.pipeline_mode<synchronous>, transform_indices = @transform_1, window_bounds = array<i64: 4, 128>}, {pipeline_mode = #tpu.pipeline_mode<synchronous>, transform_indices = @transform_2, window_bounds = array<i64: 1, 128>}, {pipeline_mode = #tpu.pipeline_mode<synchronous>, transform_indices = @transform_3, window_bounds = array<i64: 128, 128>}, {pipeline_mode = #tpu.pipeline_mode<synchronous>, transform_indices = @transform_4, window_bounds = array<i64: 1, 128>}, {pipeline_mode = #tpu.pipeline_mode<synchronous>, transform_indices = @transform_5, window_bounds = array<i64: 128, 128>}, {pipeline_mode = #tpu.pipeline_mode<synchronous>, transform_indices = @transform_6, window_bounds = array<i64: 1, 128>}, {transform_indices = @transform_7, window_bounds = array<i64: 8, 128>}]} {
    %c0 = arith.constant 0 : index
    %c0_0 = arith.constant 0 : index
    %0 = vector.load %arg1[%c0, %c0_0] : memref<8x4xbf16, #tpu.memory_space<vmem>>, vector<8x4xbf16>
    %c0_1 = arith.constant 0 : index
    %c0_2 = arith.constant 0 : index
    %1 = vector.load %arg2[%c0_1, %c0_2] : memref<4x128xbf16, #tpu.memory_space<vmem>>, vector<4x128xbf16>
    %cst = arith.constant dense<0.000000e+00> : vector<8x128xf32>
    %2 = tpu.matmul %0, %1, %cst {dimension_numbers = #tpu.dot_dimension_numbers<[1], [0], [0], [1], [0, 0, 1, 1], [], []>} : vector<8x4xbf16>, vector<4x128xbf16>, vector<8x128xf32> -> vector<8x128xf32>
    %c0_3 = arith.constant 0 : index
    %c0_4 = arith.constant 0 : index
    %3 = vector.load %arg3[%c0_3, %c0_4] : memref<1x128xf32, #tpu.memory_space<vmem>>, vector<1x128xf32>
    %4 = vector.broadcast %3 : vector<1x128xf32> to vector<8x128xf32>
    %5 = arith.addf %2, %4 : vector<8x128xf32>
    %cst_5 = arith.constant 0.000000e+00 : f32
    %6 = vector.broadcast %cst_5 : f32 to vector<8x128xf32>
    %7 = arith.maximumf %5, %6 : vector<8x128xf32>
    %8 = arith.truncf %7 : vector<8x128xf32> to vector<8x128xbf16>
    %c0_6 = arith.constant 0 : index
    %c0_7 = arith.constant 0 : index
    %9 = vector.load %arg4[%c0_6, %c0_7] : memref<128x128xbf16, #tpu.memory_space<vmem>>, vector<128x128xbf16>
    %cst_8 = arith.constant dense<0.000000e+00> : vector<8x128xf32>
    %10 = tpu.matmul %8, %9, %cst_8 {dimension_numbers = #tpu.dot_dimension_numbers<[1], [0], [0], [1], [0, 0, 1, 1], [], []>} : vector<8x128xbf16>, vector<128x128xbf16>, vector<8x128xf32> -> vector<8x128xf32>
    %c0_9 = arith.constant 0 : index
    %c0_10 = arith.constant 0 : index
    %11 = vector.load %arg5[%c0_9, %c0_10] : memref<1x128xf32, #tpu.memory_space<vmem>>, vector<1x128xf32>
    %12 = vector.broadcast %11 : vector<1x128xf32> to vector<8x128xf32>
    %13 = arith.addf %10, %12 : vector<8x128xf32>
    %cst_11 = arith.constant 0.000000e+00 : f32
    %14 = vector.broadcast %cst_11 : f32 to vector<8x128xf32>
    %15 = arith.maximumf %13, %14 : vector<8x128xf32>
    %16 = arith.truncf %15 : vector<8x128xf32> to vector<8x128xbf16>
    %c0_12 = arith.constant 0 : index
    %c0_13 = arith.constant 0 : index
    %17 = vector.load %arg6[%c0_12, %c0_13] : memref<128x128xbf16, #tpu.memory_space<vmem>>, vector<128x128xbf16>
    %cst_14 = arith.constant dense<0.000000e+00> : vector<8x128xf32>
    %18 = tpu.matmul %16, %17, %cst_14 {dimension_numbers = #tpu.dot_dimension_numbers<[1], [0], [0], [1], [0, 0, 1, 1], [], []>} : vector<8x128xbf16>, vector<128x128xbf16>, vector<8x128xf32> -> vector<8x128xf32>
    %c0_15 = arith.constant 0 : index
    %c0_16 = arith.constant 0 : index
    %19 = vector.load %arg7[%c0_15, %c0_16] : memref<1x128xf32, #tpu.memory_space<vmem>>, vector<1x128xf32>
    %20 = vector.broadcast %19 : vector<1x128xf32> to vector<8x128xf32>
    %21 = arith.addf %18, %20 : vector<8x128xf32>
    %c0_17 = arith.constant 0 : index
    %c0_18 = arith.constant 0 : index
    %22 = vector.load %arg8[%c0_17, %c0_18] : memref<8x128xf32, #tpu.memory_space<vmem>>, vector<8x128xf32>
    tpu.vector_store %arg8[%c0_17, %c0_18], %21 {strides = array<i32>} : memref<8x128xf32, #tpu.memory_space<vmem>>, vector<8x128xf32>,
    return
  }
  func.func @transform_0(%arg0: i32) -> (i32, i32) {
    %c0_i32 = arith.constant 0 : i32
    %c0_i32_0 = arith.constant 0 : i32
    return %arg0, %c0_i32 : i32, i32
  }
  func.func @transform_1(%arg0: i32) -> (i32, i32) {
    %c0_i32 = arith.constant 0 : i32
    %c0_i32_0 = arith.constant 0 : i32
    %c0_i32_1 = arith.constant 0 : i32
    return %c0_i32, %c0_i32_0 : i32, i32
  }
  func.func @transform_2(%arg0: i32) -> (i32, i32) {
    %c0_i32 = arith.constant 0 : i32
    %c0_i32_0 = arith.constant 0 : i32
    %c0_i32_1 = arith.constant 0 : i32
    return %c0_i32, %c0_i32_0 : i32, i32
  }
  func.func @transform_3(%arg0: i32) -> (i32, i32) {
    %c0_i32 = arith.constant 0 : i32
    %c0_i32_0 = arith.constant 0 : i32
    %c0_i32_1 = arith.constant 0 : i32
    return %c0_i32, %c0_i32_0 : i32, i32
  }
  func.func @transform_4(%arg0: i32) -> (i32, i32) {
    %c0_i32 = arith.constant 0 : i32
    %c0_i32_0 = arith.constant 0 : i32
    %c0_i32_1 = arith.constant 0 : i32
    return %c0_i32, %c0_i32_0 : i32, i32
  }
  func.func @transform_5(%arg0: i32) -> (i32, i32) {
    %c0_i32 = arith.constant 0 : i32
    %c0_i32_0 = arith.constant 0 : i32
    %c0_i32_1 = arith.constant 0 : i32
    return %c0_i32, %c0_i32_0 : i32, i32
  }
  func.func @transform_6(%arg0: i32) -> (i32, i32) {
    %c0_i32 = arith.constant 0 : i32
    %c0_i32_0 = arith.constant 0 : i32
    %c0_i32_1 = arith.constant 0 : i32
    return %c0_i32, %c0_i32_0 : i32, i32
  }
  func.func @transform_7(%arg0: i32) -> (i32, i32) {
    %c0_i32 = arith.constant 0 : i32
    %c0_i32_0 = arith.constant 0 : i32
    return %arg0, %c0_i32 : i32, i32
  }
}

</mosaic_0001>

<bundles_post_ra>
// kernel: tpu_custom_call.1
= control target key start
LH: loop header
LB: loop body
LE: loop exit
PB: predicated region body
PF: predicated region fallthrough
CT: control target
= control target key end

     0   :  { %12 = vsyncpa [#allocation3], 0  ;;  %s625_s0 = inlined_call_operand.vmem [shape: bf16[8,4], index: 0, kind: input, shape index: {}]   ;;  %s626_s1 = inlined_call_operand.vmem [shape: bf16[4,128], index: 1, kind: input, shape index: {}]   ;;  %s627_s2 = inlined_call_operand.vmem [shape: f32[1,128], index: 2, kind: input, shape index: {}]   ;;  %s628_s3 = inlined_call_operand.hbm [shape: bf16[128,128], index: 3, kind: input, shape index: {}]   ;;  %s629_s4 = inlined_call_operand.vmem [shape: f32[1,128], index: 4, kind: input, shape index: {}]   ;;  %s630_s5 = inlined_call_operand.hbm [shape: bf16[128,128], index: 5, kind: input, shape index: {}]   ;;  %s631_s6 = inlined_call_operand.vmem [shape: f32[1,128], index: 6, kind: input, shape index: {}]   ;;  %s632_s7 = inlined_call_operand.hbm [shape: f32[8,128], index: 7, kind: output, shape index: {}]  }
   0x1   :  { %13 = vsyncpa [#allocation6], 0 }
   0x2   :  { %14 = vsyncpa [#allocation4], 0  ;;  %s531_s24 = smov [#allocation2]  }
   0x3   :  { %s26_s25 = sshll.u32 %s531_s24, 4  ;;  %s27_s25 = int_to_ptr.vmem [resolvable:$true] %s26_s25 }
   0x4   :  { %s473_s26 = scalar_lea.vmem %s27_s25, 1024  ;;  %p478_p1 = scmp.lt.s32.totalorder %s27_s25, %s27_s25 }
   0x5   :  { %p474_p0 = scmp.ne.s32.totalorder %s27_s25, %s473_s26  ;;  %p479_p2 = scmp.lt.s32.totalorder %s473_s26, %s473_s26 }
   0x7   :  { %p480_p3 = por %p479_p2, %p478_p1 }
   0x9   :  { %p481_p4 = pnand %p480_p3, %p474_p0 }
   0xb   :  { %484 = shalt.err (!%p481_p4)
}
   0xc   :  { %s532_s27 = smov 64   ;;  %s533_s28 = smov 4  }
   0xd   :  { %32 = dma.hbm_to_vmem [thread:$0]  %s628_s3, 1024, %s27_s25, [#allocation3], %s532_s27, %s532_s27, %s533_s28  }
   0xe   :  { %s534_s8 = smov [#allocation5]  }
   0xf   :  { %s40_s9 = sshll.u32 %s534_s8, 4  ;;  %s41_s9 = int_to_ptr.vmem [resolvable:$true] %s40_s9 }
  0x10   :  { %s493_s10 = scalar_lea.vmem %s41_s9, 1024  ;;  %p498_p6 = scmp.lt.s32.totalorder %s41_s9, %s41_s9 }
  0x11   :  { %p494_p5 = scmp.ne.s32.totalorder %s41_s9, %s493_s10  ;;  %p499_p7 = scmp.lt.s32.totalorder %s493_s10, %s493_s10 }
  0x13   :  { %p500_p8 = por %p499_p7, %p498_p6 }
  0x15   :  { %p501_p9 = pnand %p500_p8, %p494_p5 }
  0x17   :  { %504 = shalt.err (!%p501_p9)
}
  0x18   :  { %46 = dma.hbm_to_vmem [thread:$0]  %s630_s5, 1024, %s41_s9, [#allocation6], %s532_s27, %s532_s27, %s533_s28  }
  0x19   :  { %525 = dma.done.wait [#allocation3], 1024  }
  0x1a   :  { %526 = vsyncadd [#allocation3], 4294966272 }
  0x1b   :  { %527 = dma.done.wait [#allocation6], 1024  }
  0x1c   :  { %528 = vsyncadd [#allocation6], 4294966272  ;;  %v535_v0 = vmov 0.0   ;;  %vm536_vm0 = vmmov 0   ;;  %vm69_vm1 = vcmask 1041408   ;;  %vm65_vm2 = vcmask 31744  }
  0x1d   :  { %396 = vmatprep.subr.bf16.mxu0 %v535_v0  ;;  %398 = vmatprep.mubr.msk.bf16.mxu0 %vm536_vm0, %v535_v0  ;;  %v57_v1 = vld [vmem:[%s626_s1] sm:$0x3]  ;;  %v449_v3 = vld [vmem:[#allocation2 + $0x38] sm:$0xff]   ;;  %v450_v5 = vld [vmem:[#allocation2 + $0x30] sm:$0xff]   ;;  %s537_s18 = smov [#allocation7]  }
  0x1e   :  { %402 = vmatprep.subr.bf16.mxu1 %v535_v0  ;;  %418 = vmatprep.mubr.msk.bf16.mxu1 %vm536_vm0, %v535_v0  ;;  %v71_v2 = vsel %vm69_vm1, %v57_v1, 0  ;;  %v56_v4 = vld [vmem:[%s625_s0] sm:$0xf]  ;;  %v451_v6 = vld [vmem:[#allocation2 + $0x28] sm:$0xff]   ;;  %v453_v8 = vld [vmem:[#allocation2 + $0x18] sm:$0xff]   ;;  %s346_s19 = sshll.u32 %s537_s18, 4  ;;  %s347_s19 = int_to_ptr.vmem [resolvable:$true] %s346_s19 }
  0x1f   :  { %397 = vmatpush3.bf16.msra.mxu0 %v71_v2  ;;  %403 = vmatpush3.bf16.msra.mxu1 %v449_v3  ;;  %v452_v7 = vld [vmem:[#allocation2 + $0x20] sm:$0xff]   ;;  %v454_v9 = vld [vmem:[#allocation2 + $0x10] sm:$0xff]   ;;  %v455_v10 = vld [vmem:[#allocation2 + $0x8] sm:$0xff]   ;;  %p510_p11 = scmp.lt.s32.totalorder %s347_s19, %s347_s19 }
  0x20   :  { %422 = vmatprep.subr.bf16.mxu0 %v535_v0  ;;  %404 = vmatprep.subr.bf16.mxu1 %v535_v0  ;;  %v456_v11 = vld [vmem:[#allocation2] sm:$0xff]   ;;  %v457_v12 = vld [vmem:[#allocation5 + $0x38] sm:$0xff]   ;;  %v458_v13 = vld [vmem:[#allocation5 + $0x30] sm:$0xff]  }
  0x21   :  { %v459_v14 = vld [vmem:[#allocation5 + $0x28] sm:$0xff]   ;;  %v460_v15 = vld [vmem:[#allocation5 + $0x20] sm:$0xff]   ;;  %v461_v16 = vld [vmem:[#allocation5 + $0x18] sm:$0xff]  }
  0x22   :  { %399 = vmatmul.mubr.msk.bf16.vlgmr.msra.gmra.mxu0 %vm65_vm2, %v56_v4  ;;  %v462_v17 = vld [vmem:[#allocation5 + $0x10] sm:$0xff]   ;;  %v356_v18 = vld [vmem:[%s627_s2] ss:$0 sm:$0xff]  ;;  %v463_v26 = vld [vmem:[#allocation5 + $0x8] sm:$0xff]  }
  0x23   :  { %438 = vmatprep.mubr.msk.bf16.mxu0 %vm536_vm0, %v535_v0  ;;  %405 = vmatpush3.bf16.msra.mxu1 %v450_v5  ;;  %v464_v27 = vld [vmem:[#allocation5] sm:$0xff]  }
  0x24   :  { %406 = vmatprep.subr.bf16.mxu1 %v535_v0  ;;  %423 = vmatpush3.bf16.msra.mxu0 %v457_v12  ;;  %v358_v28 = vld [vmem:[%s629_s4] ss:$0 sm:$0xff]  ;;  %s505_s4 = scalar_lea.vmem %s347_s19, 128 }
  0x25   :  { %424 = vmatprep.subr.bf16.mxu0 %v535_v0  ;;  %v367_v36 = vld [vmem:[%s631_s6] ss:$0 sm:$0xff]  ;;  %p506_p10 = scmp.ne.s32.totalorder %s347_s19, %s505_s4  ;;  %p511_p12 = scmp.lt.s32.totalorder %s505_s4, %s505_s4 }
  0x27   :  { %407 = vmatpush3.bf16.msra.mxu1 %v451_v6  ;;  %p512_p13 = por %p511_p12, %p510_p11 }
  0x28   :  { %408 = vmatprep.subr.bf16.mxu1 %v535_v0  ;;  %425 = vmatpush3.bf16.msra.mxu0 %v458_v13 }
  0x29   :  { %426 = vmatprep.subr.bf16.mxu0 %v535_v0  ;;  %p513_p0 = pnand %p512_p13, %p506_p10 }
  0x2b   :  { %409 = vmatpush3.bf16.msra.mxu1 %v452_v7 }
  0x2c   :  { %410 = vmatprep.subr.bf16.mxu1 %v535_v0  ;;  %427 = vmatpush3.bf16.msra.mxu0 %v459_v14 }
  0x2d   :  { %428 = vmatprep.subr.bf16.mxu0 %v535_v0 }
  0x2f   :  { %411 = vmatpush3.bf16.msra.mxu1 %v453_v8 }
  0x30   :  { %412 = vmatprep.subr.bf16.mxu1 %v535_v0  ;;  %429 = vmatpush3.bf16.msra.mxu0 %v460_v15 }
  0x31   :  { %430 = vmatprep.subr.bf16.mxu0 %v535_v0 }
  0x33   :  { %413 = vmatpush3.bf16.msra.mxu1 %v454_v9 }
  0x34   :  { %414 = vmatprep.subr.bf16.mxu1 %v535_v0  ;;  %431 = vmatpush3.bf16.msra.mxu0 %v461_v16 }
  0x35   :  { %432 = vmatprep.subr.bf16.mxu0 %v535_v0 }
  0x37   :  { %415 = vmatpush3.bf16.msra.mxu1 %v455_v10 }
  0x38   :  { %416 = vmatprep.subr.bf16.mxu1 %v535_v0  ;;  %433 = vmatpush3.bf16.msra.mxu0 %v462_v17 }
  0x39   :  { %434 = vmatprep.subr.bf16.mxu0 %v535_v0 }
  0x3b   :  { %417 = vmatpush3.bf16.msra.mxu1 %v456_v11 }
  0x3c   :  { %435 = vmatpush3.bf16.msra.mxu0 %v463_v26 }
  0x3d   :  { %436 = vmatprep.subr.bf16.mxu0 %v535_v0 }
  0x40   :  { %437 = vmatpush3.bf16.msra.mxu0 %v464_v27 }
  0xe2   :  { %v107_v19 = vpop.f32.mrf.mxu0 }
  0xe3   :  { %v108_v20 = vadd.f32 %v356_v18, %v107_v19 }
  0xe4   :  { %v400_v21 = vpop.f32.mrf.mxu0 }
  0xe5   :  { %v113_v22 = vmax.f32 %v108_v20, 0.0 }
  0xe6   :  { %v110_v23 = vpop.f32.mrf.mxu0 }
  0xe7   :  { %v114_v24 = vpack.c.bf16 %v113_v22, %v113_v22 }
  0xe8   :  { %v401_v25 = vpop.f32.mrf.mxu0 }
  0xe9   :  { %419 = vmatmul.mubr.bf16.vlgmr.msra.gmra.mxu1 %v114_v24 }
 0x1a9   :  { %v220_v29 = vpop.f32.mrf.mxu1 }
 0x1aa   :  { %v221_v30 = vadd.f32 %v358_v28, %v220_v29 }
 0x1ab   :  { %v420_v31 = vpop.f32.mrf.mxu1 }
 0x1ac   :  { %v226_v32 = vmax.f32 %v221_v30, 0.0 }
 0x1ad   :  { %v223_v33 = vpop.f32.mrf.mxu1 }
 0x1ae   :  { %v227_v34 = vpack.c.bf16 %v226_v32, %v226_v32 }
 0x1af   :  { %v421_v35 = vpop.f32.mrf.mxu1 }
 0x1b0   :  { %439 = vmatmul.mubr.bf16.vlgmr.msra.gmra.mxu0 %v227_v34 }
 0x270   :  { %v333_v37 = vpop.f32.mrf.mxu0 }
 0x271   :  { %v334_v38 = vadd.f32 %v367_v36, %v333_v37 }
 0x272   :  { %v440_v39 = vpop.f32.mrf.mxu0 }
 0x273   :  { %339 = vst [vmem:[#allocation7] sm:$0xff] %v334_v38 }
 0x274   :  { %v336_v40 = vpop.f32.mrf.mxu0 }
 0x275   :  { %516 = shalt.err (!%p513_p0)
}
 0x276   :  { %349 = dma.vmem_to_hbm [thread:$0]  %s347_s19, 128, %s632_s7, [#allocation4]   ;;  %v441_v41 = vpop.f32.mrf.mxu0 }
 0x277   :  { %529 = dma.done.wait [#allocation4], 128  }
 0x278   :  { %530 = vsyncadd [#allocation4], 4294967168 }
 0x279   :  { %353 = vsyncpa [#allocation3], 1 }
 0x27a   :  { %354 = vsyncpa [#allocation6], 1 }
 0x27b   :  { %355 = vsyncpa [#allocation4], 1 }

</bundles_post_ra>
